<compile_context>
chip_gen: v7x
topology: tpu7x:2x2x1
jax: 0.10.0
libtpu: 0.0.40
codegen_flags: <defaults>
</compile_context>

<pallas_src>
import jax
import jax.numpy as jnp
from jax import lax
from jax.experimental import pallas as pl
from jax.experimental.pallas import tpu as pltpu


# ----------------------------------------------------------------------------- helpers
def _round_up(v, m):
    return (v + m - 1) // m * m


def _pick_tile_b(batch, max_tile=128):
    """Batch tile (multiple of 8, <= max_tile) minimizing padded waste."""
    bp = _round_up(batch, 8)
    if bp <= max_tile:
        return bp
    best_t, best_pad = max_tile, _round_up(batch, max_tile) - batch
    for t in range(max_tile, 7, -8):
        pad = _round_up(batch, t) - batch
        if pad < best_pad:
            best_t, best_pad = t, pad
    return best_t


def _pick_tile_n(n_out):
    # 128-wide output tiles keep >=2 parallel blocks for modest N_out (v7x has
    # two TensorCores); only go 256-wide when there are plenty of tiles anyway.
    if n_out >= 512 and n_out % 256 == 0:
        return 256
    return 128


def _prep_weight(weight, n_pad, matmul_dtype):
    """Cast + transpose + pad W (N_out, N_in) -> (N_in, n_pad).

    XLA fuses this into a single pass over W; hoist it out of per-timestep
    loops if driving the single-step entry point recurrently.
    """
    n_out, _ = weight.shape
    w_t = weight.astype(matmul_dtype).T                       # (N_in, N_out)
    return jnp.pad(w_t, ((0, 0), (0, n_pad - n_out)))


def _vmem_limit(block_bytes, scratch_bytes=0):
    """Scoped VMEM limit from the double-buffered block footprint (+margin)."""
    need = 2 * block_bytes + scratch_bytes + (4 << 20)
    return int(min(max(need, 16 << 20), 64 << 20))


# ----------------------------------------------------------------------------- kernels
def _p_snu_step_kernel(b_ref, x_ref, wt_ref, s_ref, y_ref,
                       y_out_ref, s_out_ref, wx_out_ref):
    """One (TILE_B, TILE_N) output tile of a single P_SNU step."""
    # MXU-native (M,K) x (K,N): weight arrives pre-transposed / padded.
    wx = lax.dot_general(
        x_ref[...], wt_ref[...],
        dimension_numbers=(((1,), (0,)), ((), ())),
        preferred_element_type=jnp.float32,
    )
    # VPU membrane update; state tile is (1, TILE_N) (fresh state, broadcast
    # over batch rows) or (TILE_B, TILE_N) (recurrent state).
    s_new = jnp.abs(wx) + s_ref[...] * (1.0 - y_ref[...])
    # Heaviside exactly as the reference: step(b + s).
    y_new = (b_ref[0] + s_new) > 0.0
    y_out_ref[...] = y_new.astype(y_out_ref.dtype)
    s_out_ref[...] = s_new.astype(s_out_ref.dtype)
    wx_out_ref[...] = wx.astype(wx_out_ref.dtype)


def _p_snu_seq_kernel(b_ref, x_ref, wt_ref, s0_ref, y0_ref,
                      y_out_ref, s_out_ref, wx_out_ref,
                      s_state, y_state):
    """T fused timesteps; recurrent state lives in VMEM scratch across t."""
    t = pl.program_id(2)

    @pl.when(t == 0)
    def _():
        # Fresh (1, TILE_N) initial state broadcast over the batch rows.
        s_state[...] = jnp.broadcast_to(s0_ref[...], s_state.shape)
        y_state[...] = jnp.broadcast_to(y0_ref[...], y_state.shape)

    wx = lax.dot_general(
        x_ref[0], wt_ref[...],
        dimension_numbers=(((1,), (0,)), ((), ())),
        preferred_element_type=jnp.float32,
    )
    s_new = jnp.abs(wx) + s_state[...] * (1.0 - y_state[...])
    y_new = ((b_ref[0] + s_new) > 0.0).astype(jnp.float32)
    s_state[...] = s_new
    y_state[...] = y_new
    y_out_ref[0] = y_new.astype(y_out_ref.dtype)
    s_out_ref[0] = s_new.astype(s_out_ref.dtype)
    wx_out_ref[0] = wx.astype(wx_out_ref.dtype)


# ----------------------------------------------------------------------------- wrappers
def p_snu_forward(x, weight, b, s_prev, y_prev, *,
                  matmul_dtype=jnp.bfloat16, out_dtype=jnp.float32):
    """One P_SNU step.

    x:       (B, N_in)       float32
    weight:  (N_out, N_in)   float32 (PyTorch nn.Linear layout, no bias)
    b:       scalar bias
    s_prev:  (1, N_out) (fresh) or (B, N_out) (recurrent)
    y_prev:  same shape as s_prev
    returns: (y, s, wx), each (B, N_out) of `out_dtype`.

    matmul_dtype=bf16 (default) halves operand HBM traffic with f32 MXU
    accumulation; pass jnp.float32 for exact parity with the f32 reference.
    """
    B, n_in = x.shape
    n_out, n_in_w = weight.shape
    assert n_in_w == n_in

    s_prev = jnp.asarray(s_prev, jnp.float32)
    y_prev = jnp.asarray(y_prev, jnp.float32)
    assert s_prev.shape == y_prev.shape and s_prev.shape[1] == n_out
    assert s_prev.shape[0] in (1, B), "recurrent state batch must match x batch"

    tile_b = _pick_tile_b(B)
    tile_n = _pick_tile_n(n_out)
    b_pad = _round_up(B, tile_b)
    n_pad = _round_up(n_out, tile_n)

    x_p = jnp.pad(x.astype(matmul_dtype), ((0, b_pad - B), (0, 0)))
    w_t = _prep_weight(weight, n_pad, matmul_dtype)            # (N_in, n_pad)

    if s_prev.shape[0] == 1:
        state_block = (1, tile_n)
        state_map = lambda j, i, b_sref: (0, j)
        s_p = jnp.pad(s_prev, ((0, 0), (0, n_pad - n_out)))
        y_p = jnp.pad(y_prev, ((0, 0), (0, n_pad - n_out)))
    else:
        state_block = (tile_b, tile_n)
        state_map = lambda j, i, b_sref: (i, j)
        s_p = jnp.pad(s_prev, ((0, b_pad - B), (0, n_pad - n_out)))
        y_p = jnp.pad(y_prev, ((0, b_pad - B), (0, n_pad - n_out)))

    b_arr = jnp.asarray([b], dtype=jnp.float32)                # -> SMEM prefetch

    # Grid: (N_out tiles, batch tiles). Inner axis = batch, so the weight tile
    # (the larger operand) stays resident instead of re-streaming per b-tile.
    grid = (n_pad // tile_n, b_pad // tile_b)

    in_bytes = jnp.dtype(matmul_dtype).itemsize
    out_bytes = jnp.dtype(out_dtype).itemsize
    block_bytes = (tile_b * n_in * in_bytes            # x tile
                   + n_in * tile_n * in_bytes          # W^T tile
                   + 2 * state_block[0] * tile_n * 4   # s_prev, y_prev tiles
                   + 3 * tile_b * tile_n * out_bytes)  # y, s, wx tiles

    out_tile_spec = pl.BlockSpec((tile_b, tile_n), lambda j, i, b_sref: (i, j))
    out_shape = tuple(jax.ShapeDtypeStruct((b_pad, n_pad), out_dtype)
                      for _ in range(3))

    y_o, s_o, wx_o = pl.pallas_call(
        _p_snu_step_kernel,
        out_shape=out_shape,
        grid_spec=pltpu.PrefetchScalarGridSpec(
            num_scalar_prefetch=1,                                        # bias
            grid=grid,
            in_specs=[
                pl.BlockSpec((tile_b, n_in), lambda j, i, b_sref: (i, 0)),   # x
                pl.BlockSpec((n_in, tile_n), lambda j, i, b_sref: (0, j)),   # W^T
                pl.BlockSpec(state_block, state_map),                        # s_prev
                pl.BlockSpec(state_block, state_map),                        # y_prev
            ],
            out_specs=(out_tile_spec,) * 3,
        ),
        compiler_params=pltpu.CompilerParams(
            dimension_semantics=("parallel", "parallel"),
            vmem_limit_bytes=_vmem_limit(block_bytes),
        ),
    )(b_arr, x_p, w_t, s_p, y_p)

    return (y_o[:B, :n_out], s_o[:B, :n_out], wx_o[:B, :n_out])


def p_snu_sequence(xs, weight, b, s0, y0, *,
                   matmul_dtype=jnp.bfloat16, out_dtype=jnp.float32):
    """Run T P_SNU steps in ONE pallas_call (fused recurrence).

    xs: (T, B, N_in); s0/y0: (1, N_out) fresh state (initialize_state()).
    Returns (y, s, wx), each (T, B, N_out).  Time is the innermost
    "arbitrary" grid axis: the weight tile stays resident in VMEM across all
    T steps and the recurrent state lives in VMEM scratch (no per-step HBM
    round-trip for state or weight).
    """
    T, B, n_in = xs.shape
    n_out, n_in_w = weight.shape
    assert n_in_w == n_in
    s0 = jnp.asarray(s0, jnp.float32)
    y0 = jnp.asarray(y0, jnp.float32)
    assert s0.shape == (1, n_out) and y0.shape == (1, n_out)

    tile_b = _pick_tile_b(B)
    tile_n = _pick_tile_n(n_out)
    b_pad = _round_up(B, tile_b)
    n_pad = _round_up(n_out, tile_n)

    x_p = jnp.pad(xs.astype(matmul_dtype), ((0, 0), (0, b_pad - B), (0, 0)))
    w_t = _prep_weight(weight, n_pad, matmul_dtype)
    s_p = jnp.pad(s0, ((0, 0), (0, n_pad - n_out)))
    y_p = jnp.pad(y0, ((0, 0), (0, n_pad - n_out)))
    b_arr = jnp.asarray([b], dtype=jnp.float32)

    grid = (n_pad // tile_n, b_pad // tile_b, T)   # t innermost => state carry

    in_bytes = jnp.dtype(matmul_dtype).itemsize
    out_bytes = jnp.dtype(out_dtype).itemsize
    block_bytes = (tile_b * n_in * in_bytes
                   + n_in * tile_n * in_bytes
                   + 2 * tile_n * 4
                   + 3 * tile_b * tile_n * out_bytes)
    scratch_bytes = 2 * tile_b * tile_n * 4

    out_tile_spec = pl.BlockSpec((1, tile_b, tile_n),
                                 lambda j, i, t, b_sref: (t, i, j))
    out_shape = tuple(jax.ShapeDtypeStruct((T, b_pad, n_pad), out_dtype)
                      for _ in range(3))

    y_o, s_o, wx_o = pl.pallas_call(
        _p_snu_seq_kernel,
        out_shape=out_shape,
        grid_spec=pltpu.PrefetchScalarGridSpec(
            num_scalar_prefetch=1,
            grid=grid,
            in_specs=[
                pl.BlockSpec((1, tile_b, n_in),
                             lambda j, i, t, b_sref: (t, i, 0)),   # x_t (streams)
                pl.BlockSpec((n_in, tile_n),
                             lambda j, i, t, b_sref: (0, j)),      # W^T (resident)
                pl.BlockSpec((1, tile_n),
                             lambda j, i, t, b_sref: (0, j)),      # s0
                pl.BlockSpec((1, tile_n),
                             lambda j, i, t, b_sref: (0, j)),      # y0
            ],
            out_specs=(out_tile_spec,) * 3,
            scratch_shapes=[pltpu.VMEM((tile_b, tile_n), jnp.float32),   # s
                            pltpu.VMEM((tile_b, tile_n), jnp.float32)],  # y
        ),
        compiler_params=pltpu.CompilerParams(
            dimension_semantics=("parallel", "parallel", "arbitrary"),
            vmem_limit_bytes=_vmem_limit(block_bytes, scratch_bytes),
        ),
    )(b_arr, x_p, w_t, s_p, y_p)

    return (y_o[:, :B, :n_out], s_o[:, :B, :n_out], wx_o[:, :B, :n_out])


def xavier_uniform(key, shape):
    """Matches torch.nn.init.xavier_uniform_ for a (fan_out, fan_in) weight."""
    fan_out, fan_in = shape
    limit = (6.0 / (fan_in + fan_out)) ** 0.5
    return jax.random.uniform(key, shape, jnp.float32, -limit, limit)


# ----------------------------------------------------------------------------- demo
if __name__ == "__main__":
    key = jax.random.PRNGKey(0)
    k_w, k_x, k_xs = jax.random.split(key, 3)

    batch = 2
    input_neuron = 16
    output_neuron = 32
    seq_len = 8
    initial_bias = -2.0

    weight = xavier_uniform(k_w, (output_neuron, input_neuron))
    x = jax.random.normal(k_x, (batch, input_neuron), jnp.float32)

    # initialize_state(): zeros of shape (1, output_neuron)
    s0 = jnp.zeros((1, output_neuron), jnp.float32)
    y0 = jnp.zeros((1, output_neuron), jnp.float32)

    # ---- step 1: fresh (1, N_out) state, f32 path (exact parity) ----
    y1, s1, wx1 = p_snu_forward(x, weight, initial_bias, s0, y0,
                                matmul_dtype=jnp.float32)
    jax.block_until_ready((y1, s1, wx1))

    wx_ref = x @ weight.T
    s1_ref = jnp.abs(wx_ref) + s0 * (1.0 - y0)
    y1_ref = (initial_bias + s1_ref > 0.0).astype(jnp.float32)
    assert y1.shape == (batch, output_neuron)
    assert jnp.allclose(wx1, wx_ref, atol=1e-5)
    assert jnp.allclose(s1, s1_ref, atol=1e-5)
    assert jnp.allclose(y1, y1_ref)

    # ---- step 2: recurrent (B, N_out) state path, f32 ----
    y2, s2, wx2 = p_snu_forward(x, weight, initial_bias, s1, y1,
                                matmul_dtype=jnp.float32)
    jax.block_until_ready((y2, s2, wx2))
    s2_ref = jnp.abs(wx_ref) + s1_ref * (1.0 - y1_ref)
    y2_ref = (initial_bias + s2_ref > 0.0).astype(jnp.float32)
    assert jnp.allclose(wx2, wx_ref, atol=1e-5)
    assert jnp.allclose(s2, s2_ref, atol=1e-5)
    assert jnp.allclose(y2, y2_ref)

    # ---- default fast path: bf16 operands + compact bf16 outputs ----
    y1b, s1b, wx1b = p_snu_forward(x, weight, initial_bias, s0, y0,
                                   out_dtype=jnp.bfloat16)
    jax.block_until_ready((y1b, s1b, wx1b))
    assert y1b.dtype == jnp.bfloat16 and wx1b.shape == (batch, output_neuron)
    assert bool(jnp.all(jnp.isfinite(s1b.astype(jnp.float32))))
    assert jnp.allclose(wx1b.astype(jnp.float32), wx_ref, atol=1e-1)

    # ---- fused time loop: seq_len steps in one pallas_call (f32 parity) ----
    xs = jax.random.normal(k_xs, (seq_len, batch, input_neuron), jnp.float32)
    ys, ss, wxs = p_snu_sequence(xs, weight, initial_bias, s0, y0,
                                 matmul_dtype=jnp.float32)
    jax.block_until_ready((ys, ss, wxs))

    s_r = jnp.zeros((1, output_neuron), jnp.float32)
    y_r = jnp.zeros((1, output_neuron), jnp.float32)
    for t in range(seq_len):
        wx_r = xs[t] @ weight.T
        s_r = jnp.abs(wx_r) + s_r * (1.0 - y_r)
        y_r = (initial_bias + s_r > 0.0).astype(jnp.float32)
        assert jnp.allclose(wxs[t], wx_r, atol=1e-4)
        assert jnp.allclose(ss[t], s_r, atol=5e-4)
        assert jnp.allclose(ys[t], y_r)

    print("KERNEL_OK")
</pallas_src>

<mosaic_0001>
module attributes {stable_mosaic.version = 11 : i64} {
  func.func @_p_snu_step_kernel(%arg0: i32, %arg1: i32, %arg2: memref<1xf32, #tpu.memory_space<smem>>, %arg3: memref<8x16xf32, #tpu.memory_space<vmem>>, %arg4: memref<16x128xf32, #tpu.memory_space<vmem>>, %arg5: memref<1x128xf32, #tpu.memory_space<vmem>>, %arg6: memref<1x128xf32, #tpu.memory_space<vmem>>, %arg7: memref<8x128xf32, #tpu.memory_space<vmem>>, %arg8: memref<8x128xf32, #tpu.memory_space<vmem>>, %arg9: memref<8x128xf32, #tpu.memory_space<vmem>>) attributes {dimension_semantics = [#tpu.dimension_semantics<parallel>, #tpu.dimension_semantics<parallel>], iteration_bounds = array<i64: 1, 1>, scalar_prefetch = 1 : i64, scratch_operands = 0 : i64, tpu.core_type = #tpu.core_type<tc>, window_params = [{transform_indices = @transform_0, window_bounds = array<i64: 8, 16>}, {transform_indices = @transform_1, window_bounds = array<i64: 16, 128>}, {transform_indices = @transform_2, window_bounds = array<i64: 1, 128>}, {transform_indices = @transform_3, window_bounds = array<i64: 1, 128>}, {transform_indices = @transform_4, window_bounds = array<i64: 8, 128>}, {transform_indices = @transform_5, window_bounds = array<i64: 8, 128>}, {transform_indices = @transform_6, window_bounds = array<i64: 8, 128>}]} {
    %c0 = arith.constant 0 : index
    %c0_0 = arith.constant 0 : index
    %0 = vector.load %arg3[%c0, %c0_0] : memref<8x16xf32, #tpu.memory_space<vmem>>, vector<8x16xf32>
    %c0_1 = arith.constant 0 : index
    %c0_2 = arith.constant 0 : index
    %1 = vector.load %arg4[%c0_1, %c0_2] : memref<16x128xf32, #tpu.memory_space<vmem>>, vector<16x128xf32>
    %cst = arith.constant dense<0.000000e+00> : vector<8x128xf32>
    %2 = tpu.matmul %0, %1, %cst {dimension_numbers = #tpu.dot_dimension_numbers<[1], [0], [0], [1], [0, 0, 1, 1], [], []>} : vector<8x16xf32>, vector<16x128xf32>, vector<8x128xf32> -> vector<8x128xf32>
    %3 = math.absf %2 : vector<8x128xf32>
    %c0_3 = arith.constant 0 : index
    %c0_4 = arith.constant 0 : index
    %4 = vector.load %arg5[%c0_3, %c0_4] : memref<1x128xf32, #tpu.memory_space<vmem>>, vector<1x128xf32>
    %c0_5 = arith.constant 0 : index
    %c0_6 = arith.constant 0 : index
    %5 = vector.load %arg6[%c0_5, %c0_6] : memref<1x128xf32, #tpu.memory_space<vmem>>, vector<1x128xf32>
    %cst_7 = arith.constant 1.000000e+00 : f32
    %6 = vector.broadcast %cst_7 : f32 to vector<1x128xf32>
    %7 = arith.subf %6, %5 : vector<1x128xf32>
    %8 = arith.mulf %4, %7 : vector<1x128xf32>
    %9 = vector.broadcast %8 : vector<1x128xf32> to vector<8x128xf32>
    %10 = arith.addf %3, %9 : vector<8x128xf32>
    %c0_8 = arith.constant 0 : index
    %11 = memref.load %arg2[%c0_8] : memref<1xf32, #tpu.memory_space<smem>>
    %12 = vector.broadcast %11 : f32 to vector<8x128xf32>
    %13 = arith.addf %12, %10 : vector<8x128xf32>
    %cst_9 = arith.constant 0.000000e+00 : f32
    %14 = vector.broadcast %cst_9 : f32 to vector<8x128xf32>
    %15 = arith.cmpf ogt, %13, %14 : vector<8x128xf32>
    %16 = arith.extui %15 : vector<8x128xi1> to vector<8x128xi32>
    %17 = arith.sitofp %16 : vector<8x128xi32> to vector<8x128xf32>
    %c0_10 = arith.constant 0 : index
    %c0_11 = arith.constant 0 : index
    %18 = vector.load %arg7[%c0_10, %c0_11] : memref<8x128xf32, #tpu.memory_space<vmem>>, vector<8x128xf32>
    tpu.vector_store %arg7[%c0_10, %c0_11], %17 {strides = array<i32>} : memref<8x128xf32, #tpu.memory_space<vmem>>, vector<8x128xf32>,
    %c0_12 = arith.constant 0 : index
    %c0_13 = arith.constant 0 : index
    %19 = vector.load %arg8[%c0_12, %c0_13] : memref<8x128xf32, #tpu.memory_space<vmem>>, vector<8x128xf32>
    tpu.vector_store %arg8[%c0_12, %c0_13], %10 {strides = array<i32>} : memref<8x128xf32, #tpu.memory_space<vmem>>, vector<8x128xf32>,
    %c0_14 = arith.constant 0 : index
    %c0_15 = arith.constant 0 : index
    %20 = vector.load %arg9[%c0_14, %c0_15] : memref<8x128xf32, #tpu.memory_space<vmem>>, vector<8x128xf32>
    tpu.vector_store %arg9[%c0_14, %c0_15], %2 {strides = array<i32>} : memref<8x128xf32, #tpu.memory_space<vmem>>, vector<8x128xf32>,
    return
  }
  func.func @transform_0(%arg0: i32, %arg1: i32, %arg2: memref<1xf32, #tpu.memory_space<smem>>) -> (i32, i32) {
    %c0_i32 = arith.constant 0 : i32
    %c0_i32_0 = arith.constant 0 : i32
    return %arg1, %c0_i32 : i32, i32
  }
  func.func @transform_1(%arg0: i32, %arg1: i32, %arg2: memref<1xf32, #tpu.memory_space<smem>>) -> (i32, i32) {
    %c0_i32 = arith.constant 0 : i32
    %c0_i32_0 = arith.constant 0 : i32
    return %c0_i32, %arg0 : i32, i32
  }
  func.func @transform_2(%arg0: i32, %arg1: i32, %arg2: memref<1xf32, #tpu.memory_space<smem>>) -> (i32, i32) {
    %c0_i32 = arith.constant 0 : i32
    %c0_i32_0 = arith.constant 0 : i32
    return %c0_i32, %arg0 : i32, i32
  }
  func.func @transform_3(%arg0: i32, %arg1: i32, %arg2: memref<1xf32, #tpu.memory_space<smem>>) -> (i32, i32) {
    %c0_i32 = arith.constant 0 : i32
    %c0_i32_0 = arith.constant 0 : i32
    return %c0_i32, %arg0 : i32, i32
  }
  func.func @transform_4(%arg0: i32, %arg1: i32, %arg2: memref<1xf32, #tpu.memory_space<smem>>) -> (i32, i32) {
    %c0_i32 = arith.constant 0 : i32
    return %arg1, %arg0 : i32, i32
  }
  func.func @transform_5(%arg0: i32, %arg1: i32, %arg2: memref<1xf32, #tpu.memory_space<smem>>) -> (i32, i32) {
    %c0_i32 = arith.constant 0 : i32
    return %arg1, %arg0 : i32, i32
  }
  func.func @transform_6(%arg0: i32, %arg1: i32, %arg2: memref<1xf32, #tpu.memory_space<smem>>) -> (i32, i32) {
    %c0_i32 = arith.constant 0 : i32
    return %arg1, %arg0 : i32, i32
  }
}

</mosaic_0001>

<bundles_post_ra>
// kernel: tpu_custom_call.1
= control target key start
LH: loop header
LB: loop body
LE: loop exit
PB: predicated region body
PF: predicated region fallthrough
CT: control target
= control target key end

     0   :  { %14 = vsyncpa [#allocation5], 0  ;;  %s474_s0 = inlined_call_operand.<no memory space> [shape: f32[1], index: 0, kind: input, shape index: {}]   ;;  %s475_s1 = inlined_call_operand.hbm [shape: f32[8,16], index: 1, kind: input, shape index: {}]   ;;  %s476_s2 = inlined_call_operand.hbm [shape: f32[16,128], index: 2, kind: input, shape index: {}]   ;;  %s477_s3 = inlined_call_operand.vmem [shape: f32[1,128], index: 3, kind: input, shape index: {}]   ;;  %s478_s4 = inlined_call_operand.vmem [shape: f32[1,128], index: 4, kind: input, shape index: {}]   ;;  %s479_s5 = inlined_call_operand.hbm [shape: f32[8,128], index: 5, kind: output, shape index: {0}]   ;;  %s480_s6 = inlined_call_operand.hbm [shape: f32[8,128], index: 6, kind: output, shape index: {1}]   ;;  %s481_s7 = inlined_call_operand.hbm [shape: f32[8,128], index: 7, kind: output, shape index: {2}]  }
   0x1   :  { %15 = vsyncpa [#allocation8], 0 }
   0x2   :  { %16 = vsyncpa [#allocation6], 0 }
   0x3   :  { %17 = vsyncpa [#allocation11], 0  ;;  %s334_s24 = smov [#allocation4]   ;;  %s335_s26 = smov [#allocation7]  }
   0x4   :  { %s24_s25 = sshll.u32 %s334_s24, 4  ;;  %s33_s27 = sshll.u32 %s335_s26, 4  ;;  %s25_s25 = int_to_ptr.vmem [resolvable:$true] %s24_s25  ;;  %s384_s27 = int_to_ptr.vmem [resolvable:$true] %s33_s27 }
   0x5   :  { %s216_s30 = scalar_lea.hbm %s475_s1, 128 }
   0x6   :  { %p217_p0 = scmp.ne.s32.totalorder %s475_s1, %s216_s30  ;;  %p220_p1 = scmp.lt.u32.totalorder %s216_s30, %s475_s1 }
   0x8   :  { %p222_p2 = pnand %p220_p1, %p217_p0 }
   0xa   :  { %225 = shalt.err (!%p222_p2)
}
   0xb   :  { %s226_s12 = scalar_lea.vmem %s25_s25, 128  ;;  %p231_p4 = scmp.lt.s32.totalorder %s25_s25, %s25_s25 }
   0xc   :  { %p227_p3 = scmp.ne.s32.totalorder %s25_s25, %s226_s12  ;;  %p232_p5 = scmp.lt.s32.totalorder %s226_s12, %s226_s12 }
   0xe   :  { %p233_p6 = por %p232_p5, %p231_p4 }
  0x10   :  { %p234_p7 = pnand %p233_p6, %p227_p3 }
  0x12   :  { %237 = shalt.err (!%p234_p7)
}
  0x13   :  { %27 = dma.hbm_to_vmem [thread:$0]  %s475_s1, 128, %s25_s25, [#allocation5]  }
  0x14   :  { %s238_s17 = scalar_lea.hbm %s476_s2, 256 }
  0x15   :  { %p239_p8 = scmp.ne.s32.totalorder %s476_s2, %s238_s17  ;;  %p242_p9 = scmp.lt.u32.totalorder %s238_s17, %s476_s2 }
  0x17   :  { %p244_p10 = pnand %p242_p9, %p239_p8 }
  0x19   :  { %247 = shalt.err (!%p244_p10)
}
  0x1a   :  { %s248_s22 = scalar_lea.vmem %s384_s27, 256  ;;  %p253_p12 = scmp.lt.s32.totalorder %s384_s27, %s384_s27 }
  0x1b   :  { %p249_p11 = scmp.ne.s32.totalorder %s384_s27, %s248_s22  ;;  %p254_p13 = scmp.lt.s32.totalorder %s248_s22, %s248_s22 }
  0x1d   :  { %p255_p0 = por %p254_p13, %p253_p12 }
  0x1f   :  { %p256_p1 = pnand %p255_p0, %p249_p11 }
  0x21   :  { %259 = shalt.err (!%p256_p1)
}
  0x22   :  { %s336_s1 = smov 128   ;;  %s337_s23 = smov 8  }
  0x23   :  { %39 = dma.hbm_to_vmem [thread:$0]  %s476_s2, 256, %s384_s27, [#allocation8], %s336_s1, %s336_s1, %s337_s23  }
  0x24   :  { %326 = dma.done.wait [#allocation5], 128  }
  0x25   :  { %327 = vsyncadd [#allocation5], 4294967168 }
  0x26   :  { %328 = dma.done.wait [#allocation8], 256  }
  0x27   :  { %329 = vsyncadd [#allocation8], 4294967040  ;;  %v338_v0 = vmov 0.0|0.0   ;;  %vm339_vm0 = vmmov 0   ;;  %v340_v1 = vmov 0.0   ;;  %v51_v2 = vld [vmem:[#allocation7] sm:$0xff]  ;;  %v133_v6 = vlaneseq }
  0x28   :  { %203 = vmatprep.subr.bf16.mxu0 %v338_v0  ;;  %200 = vmatprep.mubr.msk.f32.mxu0 %vm339_vm0, %v340_v1  ;;  %v52_v3 = vld [vmem:[#allocation7 + $0x8] sm:$0xff]  ;;  %v50_v5 = vld [vmem:[#allocation4] sm:$0xff]  ;;  %vm53_vm1 = vcmask 130048   ;;  %s341_s29 = smov [#allocation10]   ;;  %s342_s8 = smov [#allocation12]   ;;  %v140_v17 = vstv %s474_s0 }
  0x29   :  { %v204_v4 = vpack.c.bf16 %v52_v3, %v51_v2  ;;  %v129_v7 = vld [vmem:[%s478_s4] sm:$0x1]  ;;  %v134_v9 = vshrl.u32 %v133_v6, 7  ;;  %s164_s30 = sshll.u32 %s341_s29, 4  ;;  %s174_s9 = sshll.u32 %s342_s8, 4  ;;  %s165_s30 = int_to_ptr.vmem [resolvable:$true] %s164_s30  ;;  %s424_s9 = int_to_ptr.vmem [resolvable:$true] %s174_s9 }
  0x2a   :  { %v130_v8 = vsub.f32 1.0, %v129_v7  ;;  %v128_v10 = vld [vmem:[%s477_s3] sm:$0x1]  ;;  %s343_s4 = smov [#allocation9]   ;;  %s260_s3 = scalar_lea.vmem %s165_s30, 128 }
  0x2b   :  { %205 = vmatpush3.bf16.msra.mxu0 %v204_v4  ;;  %v135_v12 = vsub.s32 0, %v134_v9  ;;  %s154_s12 = sshll.u32 %s343_s4, 4  ;;  %p261_p2 = scmp.ne.s32.totalorder %s165_s30, %s260_s3  ;;  %s426_s12 = int_to_ptr.vmem [resolvable:$true] %s154_s12 }
  0x2c   :  { %v131_v11 = vmul.f32 %v130_v8, %v128_v10  ;;  %p265_p3 = scmp.lt.s32.totalorder %s165_s30, %s165_s30  ;;  %p266_p4 = scmp.lt.s32.totalorder %s260_s3, %s260_s3 }
  0x2e   :  { %201 = vmatmul.mubr.msk.f32.vlgmr.msra.gmra.mrb[0].mxu0 %vm53_vm1, %v50_v5  ;;  %v136_v13 = vrot.slane %v131_v11, %v135_v12  ;;  %p267_p5 = por %p266_p4, %p265_p3 }
  0x30   :  { %p268_p6 = pnand %p267_p5, %p261_p2 }
 0x101   :  { %v123_v14 = vpop.f32.mrb[0].mxu0 }
 0x102   :  { %v127_v15 = vand.u32 2147483647, %v123_v14  ;;  %147 = vst [vmem:[#allocation12] sm:$0xff] %v123_v14  ;;  %v202_v16 = vpop.f32.mrb[1].mxu0 }
 0x104   :  { %v138_v18 = vadd.f32 %v136_v13, %v127_v15 }
 0x106   :  { %146 = vst [vmem:[#allocation10] sm:$0xff] %v138_v18  ;;  %v141_v19 = vadd.f32 %v140_v17, %v138_v18 }
 0x107   :  { %271 = shalt.err (!%p268_p6)
}
 0x108   :  { %s272_s0 = scalar_lea.hbm %s480_s6, 128 }
 0x109   :  { %p273_p7 = scmp.ne.s32.totalorder %s480_s6, %s272_s0  ;;  %p276_p8 = scmp.lt.u32.totalorder %s272_s0, %s480_s6 }
 0x10b   :  { %p278_p9 = pnand %p276_p8, %p273_p7 }
 0x10d   :  { %281 = shalt.err (!%p278_p9)
}
 0x10e   :  { %167 = dma.vmem_to_hbm [thread:$0]  %s165_s30, 128, %s480_s6, [#allocation11]   ;;  %vm142_vm2 = vcmp.gt.f32.partialorder %v141_v19, 0.0 }
 0x10f   :  { %s282_s21 = scalar_lea.vmem %s424_s9, 128  ;;  %p287_p11 = scmp.lt.s32.totalorder %s424_s9, %s424_s9 }
 0x110   :  { %p283_p10 = scmp.ne.s32.totalorder %s424_s9, %s282_s21  ;;  %p288_p12 = scmp.lt.s32.totalorder %s282_s21, %s282_s21 }
 0x112   :  { %p289_p13 = por %p288_p12, %p287_p11 }
 0x114   :  { %p290_p0 = pnand %p289_p13, %p283_p10 }
 0x116   :  { %293 = shalt.err (!%p290_p0)
}
 0x117   :  { %s294_s23 = scalar_lea.hbm %s481_s7, 128 }
 0x118   :  { %p295_p1 = scmp.ne.s32.totalorder %s481_s7, %s294_s23  ;;  %p298_p2 = scmp.lt.u32.totalorder %s294_s23, %s481_s7 }
 0x11a   :  { %p300_p3 = pnand %p298_p2, %p295_p1 }
 0x11c   :  { %303 = shalt.err (!%p300_p3)
}
 0x11d   :  { %177 = dma.vmem_to_hbm [thread:$0]  %s424_s9, 128, %s481_s7, [#allocation11]   ;;  %v192_v20 = vsel %vm142_vm2, 1.0, %v340_v1 }
 0x11e   :  { %145 = vst [vmem:[#allocation9] sm:$0xff] %v192_v20  ;;  %s304_s27 = scalar_lea.vmem %s426_s12, 128  ;;  %p309_p5 = scmp.lt.s32.totalorder %s426_s12, %s426_s12 }
 0x11f   :  { %p305_p4 = scmp.ne.s32.totalorder %s426_s12, %s304_s27  ;;  %p310_p6 = scmp.lt.s32.totalorder %s304_s27, %s304_s27 }
 0x121   :  { %p311_p7 = por %p310_p6, %p309_p5 }
 0x123   :  { %p312_p8 = pnand %p311_p7, %p305_p4 }
 0x125   :  { %315 = shalt.err (!%p312_p8)
}
 0x126   :  { %s316_s8 = scalar_lea.hbm %s479_s5, 128 }
 0x127   :  { %p317_p9 = scmp.ne.s32.totalorder %s479_s5, %s316_s8  ;;  %p320_p10 = scmp.lt.u32.totalorder %s316_s8, %s479_s5 }
 0x129   :  { %p322_p11 = pnand %p320_p10, %p317_p9 }
 0x12b   :  { %325 = shalt.err (!%p322_p11)
}
 0x12c   :  { %157 = dma.vmem_to_hbm [thread:$0]  %s426_s12, 128, %s479_s5, [#allocation6]  }
 0x12d   :  { %330 = dma.done.wait [#allocation6], 128  }
 0x12e   :  { %331 = vsyncadd [#allocation6], 4294967168 }
 0x12f   :  { %332 = dma.done.wait [#allocation11], 256  }
 0x130   :  { %333 = vsyncadd [#allocation11], 4294967040 }
 0x131   :  { %187 = vsyncpa [#allocation5], 1 }
 0x132   :  { %188 = vsyncpa [#allocation8], 1 }
 0x133   :  { %189 = vsyncpa [#allocation6], 1 }
 0x134   :  { %190 = vsyncpa [#allocation11], 1 }

</bundles_post_ra>
